<compile_context>
chip_gen: v7x
topology: tpu7x:2x2x1
jax: 0.10.0
libtpu: 0.0.40
codegen_flags: <defaults>
</compile_context>

<pallas_src>
import jax
import jax.numpy as jnp
from jax.experimental import pallas as pl
from jax.experimental.pallas import tpu as pltpu


def _round_up(x, m):
    return ((x + m - 1) // m) * m


# ----------------------------------------------------------------------------
# pltpu.roll convention probe (cached).  np.roll convention means
# roll(x, s)[i] == x[(i - s) % n]; we only need to know which way it goes.
# ----------------------------------------------------------------------------
_ROLL_NUMPY_CONVENTION = None


def _roll_probe_kernel(x_ref, o_ref):
    o_ref[...] = pltpu.roll(x_ref[...], 1, axis=1)


def _roll_matches_numpy_convention():
    global _ROLL_NUMPY_CONVENTION
    if _ROLL_NUMPY_CONVENTION is None:
        lanes = jax.lax.broadcasted_iota(jnp.int32, (8, 128), 1)
        rolled = pl.pallas_call(
            _roll_probe_kernel,
            out_shape=jax.ShapeDtypeStruct((8, 128), jnp.int32),
        )(lanes)
        # np.roll convention: element 0 moves to index 1.
        _ROLL_NUMPY_CONVENTION = bool(rolled[0, 1] == 0)
    return _ROLL_NUMPY_CONVENTION


# ----------------------------------------------------------------------------
# Fused conv + bias + ReLU
# ----------------------------------------------------------------------------
def conv2d_relu_pallas(x, weight, bias, stride):
    """x: (N, C_in, H, W) NCHW; weight: (C_out, C_in, K, K); bias: (C_out,)."""
    n, c_in, h, w = x.shape
    c_out, _, k, _ = weight.shape
    s = int(stride)
    dtype = x.dtype

    oh = (h - k) // s + 1
    ow = (w - k) // s + 1

    kb = -(-k // s)                      # taps per axis after space-to-depth
    hp = -(-h // s) * s
    wp = -(-w // s) * s
    h2, w2 = hp // s, wp // s
    c4 = c_in * s * s                    # channels after space-to-depth

    c4p = _round_up(c4, 8)               # contraction rows (sublane aligned)
    c_out_p = _round_up(c_out, 8)        # output rows (sublane aligned)

    l_out = oh * w2                      # "wide" flattened output length / image
    l_out_p = _round_up(l_out, 128)      # lane-dense output block width
    max_off = (kb - 1) * (w2 + 1)        # largest in-kernel tap offset
    lxp = _round_up(l_out_p + max_off, 128)

    # ---- space-to-depth the input: one cheap ~1x-bytes relayout pass ----
    x_p = jnp.pad(x, ((0, 0), (0, 0), (0, hp - h), (0, wp - w)))
    x_s2d = x_p.reshape(n, c_in, h2, s, w2, s)
    x_s2d = jnp.transpose(x_s2d, (0, 1, 3, 5, 2, 4))        # (N, C, s, s, H2, W2)
    x_flat = x_s2d.reshape(n, c4, h2 * w2)
    x_flat = x_flat[:, :, : min(h2 * w2, lxp)]
    x_kern = jnp.pad(
        x_flat, ((0, 0), (0, c4p - c4), (0, lxp - x_flat.shape[2])))

    # ---- weights: same space-to-depth reshuffle (tiny) ----
    kpad = kb * s
    w_p = jnp.pad(weight, ((0, 0), (0, 0), (0, kpad - k), (0, kpad - k)))
    w_s2d = w_p.reshape(c_out, c_in, kb, s, kb, s)
    w_s2d = jnp.transpose(w_s2d, (2, 4, 0, 1, 3, 5))        # (kb, kb, O, C, s, s)
    w_s2d = w_s2d.reshape(kb * kb, c_out, c4)
    w_kern = jnp.pad(w_s2d, ((0, 0), (0, c_out_p - c_out), (0, c4p - c4)))

    b_kern = jnp.pad(bias, (0, c_out_p - c_out)).reshape(c_out_p, 1).astype(dtype)

    n_taps = kb * kb
    roll_like_np = _roll_matches_numpy_convention()

    def kernel(w_ref, b_ref, x_ref, o_ref):
        # w_ref: (n_taps, C_out_p, C4p)   resident tap weights
        # b_ref: (C_out_p, 1)             bias
        # x_ref: (1, C4p, LXp)            one space-to-depth image, spatial on lanes
        # o_ref: (1, C_out_p, L_out_p)    lane-dense output block
        x_full = x_ref[0]                                   # (C4p, LXp)
        acc = jnp.zeros((c_out_p, l_out_p), jnp.float32)
        for t in range(n_taps):                             # unrolled: 9 taps
            i, j = divmod(t, kb)
            off = i * w2 + j
            if off == 0:
                seg = x_full[:, :l_out_p]
            else:
                shift = (lxp - off) % lxp if roll_like_np else off
                seg = pltpu.roll(x_full, shift, axis=1)[:, :l_out_p]
            acc = acc + jnp.dot(w_ref[t], seg,
                                preferred_element_type=jnp.float32)
        acc = acc + b_ref[...]                              # lane-broadcast bias
        o_ref[0] = jnp.maximum(acc, 0.0).astype(o_ref.dtype)

    bytes_f32 = 4
    cost = pl.CostEstimate(
        flops=2 * n * n_taps * c_out_p * c4p * l_out_p,
        transcendentals=0,
        bytes_accessed=(x_kern.size + w_kern.size + b_kern.size
                        + n * c_out_p * l_out_p) * bytes_f32,
    )

    out_padded = pl.pallas_call(
        kernel,
        out_shape=jax.ShapeDtypeStruct((n, c_out_p, l_out_p), dtype),
        grid=(n,),
        in_specs=[
            pl.BlockSpec((n_taps, c_out_p, c4p), lambda b: (0, 0, 0)),  # weights
            pl.BlockSpec((c_out_p, 1), lambda b: (0, 0)),               # bias
            pl.BlockSpec((1, c4p, lxp), lambda b: (b, 0, 0)),           # image b
        ],
        out_specs=pl.BlockSpec((1, c_out_p, l_out_p), lambda b: (b, 0, 0)),
        compiler_params=pltpu.CompilerParams(
            dimension_semantics=("parallel",),      # images shard across TCs on v7x
            vmem_limit_bytes=32 * 1024 * 1024,
        ),
        cost_estimate=cost,
    )(w_kern, b_kern, x_kern)

    # (N, C_out_p, L_out_p) -> keep valid rows/lanes -> (N, C_out, OH, OW) NCHW.
    out = out_padded[:, :c_out, :l_out].reshape(n, c_out, oh, w2)[:, :, :, :ow]
    return out


class CNNWithBatchNormalReLUPallas:
    """Deterministic synthetic-parameter equivalent of the PyTorch module."""

    def __init__(self, in_channels=3, out_channels=5, kernel_size=5, stride=2,
                 bn_num_features=16, key=None):
        del bn_num_features  # unused in the reference module's forward
        self.stride = stride
        if key is None:
            key = jax.random.PRNGKey(42)
        kw, kb = jax.random.split(key)
        fan_in = in_channels * kernel_size * kernel_size
        bound = 1.0 / (fan_in ** 0.5)
        self.weight = jax.random.uniform(
            kw, (out_channels, in_channels, kernel_size, kernel_size),
            dtype=jnp.float32, minval=-bound, maxval=bound)
        self.bias = jax.random.uniform(
            kb, (out_channels,), dtype=jnp.float32, minval=-bound, maxval=bound)
        # Resolve pltpu.roll's rotation convention eagerly (outside any trace).
        _roll_matches_numpy_convention()

    def __call__(self, x):
        return conv2d_relu_pallas(x, self.weight, self.bias, self.stride)


def _reference(x, weight, bias, stride):
    out = jax.lax.conv_general_dilated(
        x, weight, window_strides=(stride, stride), padding="VALID",
        dimension_numbers=("NCHW", "OIHW", "NCHW"))
    out = out + bias.reshape(1, -1, 1, 1)
    return jnp.maximum(out, 0.0)


if __name__ == "__main__":
    key = jax.random.PRNGKey(0)
    # Small shapes consistent with the module defaults: N=2, C_in=3, H=W=16.
    x = jax.random.normal(key, (2, 3, 16, 16), dtype=jnp.float32)

    model = CNNWithBatchNormalReLUPallas(
        in_channels=3, out_channels=5, kernel_size=5, stride=2,
        key=jax.random.PRNGKey(1))

    out = model(x)
    out = jax.block_until_ready(out)

    ref = _reference(x, model.weight, model.bias, model.stride)
    assert out.shape == ref.shape == (2, 5, 6, 6), out.shape
    assert jnp.allclose(out, ref, atol=1e-4, rtol=1e-4), "mismatch vs JAX conv reference"

    print("KERNEL_OK")
</pallas_src>

<mosaic_0001>
module attributes {stable_mosaic.version = 11 : i64} {
  func.func @_roll_probe_kernel(%arg0: memref<8x128xi32, #tpu.memory_space<vmem>>, %arg1: memref<8x128xi32, #tpu.memory_space<vmem>>) attributes {dimension_semantics = [], scalar_prefetch = 0 : i64, scratch_operands = 0 : i64, tpu.core_type = #tpu.core_type<tc>} {
    %c0 = arith.constant 0 : index
    %c0_0 = arith.constant 0 : index
    %0 = vector.load %arg0[%c0, %c0_0] : memref<8x128xi32, #tpu.memory_space<vmem>>, vector<8x128xi32>
    %c1_i32 = arith.constant 1 : i32
    %1 = tpu.dynamic_rotate %0 by %c1_i32 dim 1 : vector<8x128xi32>, i32 -> vector<8x128xi32>
    %c0_1 = arith.constant 0 : index
    %c0_2 = arith.constant 0 : index
    %2 = vector.load %arg1[%c0_1, %c0_2] : memref<8x128xi32, #tpu.memory_space<vmem>>, vector<8x128xi32>
    tpu.vector_store %arg1[%c0_1, %c0_2], %1 {strides = array<i32>} : memref<8x128xi32, #tpu.memory_space<vmem>>, vector<8x128xi32>,
    return
  }
}

</mosaic_0001>

<bundles_post_ra>
// kernel: tpu_custom_call.1
= control target key start
LH: loop header
LB: loop body
LE: loop exit
PB: predicated region body
PF: predicated region fallthrough
CT: control target
= control target key end

     0   :  { %6 = vsyncpa [#allocation3], 0  ;;  %s128_s0 = inlined_call_operand.hbm [shape: s32[8,128], index: 0, kind: input, shape index: {}]   ;;  %s129_s1 = inlined_call_operand.hbm [shape: s32[8,128], index: 1, kind: output, shape index: {}]  }
   0x1   :  { %7 = vsyncpa [#allocation4], 0  ;;  %s91_s6 = smov [#allocation2]   ;;  %s43_s10 = scalar_lea.hbm %s128_s0, 128 }
   0x2   :  { %s14_s7 = sshll.u32 %s91_s6, 4  ;;  %p44_p0 = scmp.ne.s32.totalorder %s128_s0, %s43_s10  ;;  %s15_s7 = int_to_ptr.vmem [resolvable:$true] %s14_s7 }
   0x3   :  { %p47_p1 = scmp.lt.u32.totalorder %s43_s10, %s128_s0 }
   0x5   :  { %p49_p2 = pnand %p47_p1, %p44_p0 }
   0x7   :  { %52 = shalt.err (!%p49_p2)
}
   0x8   :  { %s53_s15 = scalar_lea.vmem %s15_s7, 128  ;;  %p58_p4 = scmp.lt.s32.totalorder %s15_s7, %s15_s7 }
   0x9   :  { %p54_p3 = scmp.ne.s32.totalorder %s15_s7, %s53_s15  ;;  %p59_p5 = scmp.lt.s32.totalorder %s53_s15, %s53_s15 }
   0xb   :  { %p60_p6 = por %p59_p5, %p58_p4 }
   0xd   :  { %p61_p7 = pnand %p60_p6, %p54_p3 }
   0xf   :  { %64 = shalt.err (!%p61_p7)
}
  0x10   :  { %17 = dma.hbm_to_vmem [thread:$0]  %s128_s0, 128, %s15_s7, [#allocation3]  }
  0x11   :  { %87 = dma.done.wait [#allocation3], 128  }
  0x12   :  { %88 = vsyncadd [#allocation3], 4294967168  ;;  %v21_v0 = vld [vmem:[#allocation2] sm:$0xff]  ;;  %s92_s18 = smov 1   ;;  %s93_s19 = smov [#allocation5]  }
  0x13   :  { %22 = vrot.lane.b32.xlu0 %v21_v0, %s92_s18  ;;  %s31_s20 = sshll.u32 %s93_s19, 4  ;;  %s32_s20 = int_to_ptr.vmem [resolvable:$true] %s31_s20 }
  0x14   :  { %s65_s21 = scalar_lea.vmem %s32_s20, 128  ;;  %p70_p9 = scmp.lt.s32.totalorder %s32_s20, %s32_s20 }
  0x15   :  { %p66_p8 = scmp.ne.s32.totalorder %s32_s20, %s65_s21  ;;  %p71_p10 = scmp.lt.s32.totalorder %s65_s21, %s65_s21 }
  0x17   :  { %p72_p11 = por %p71_p10, %p70_p9 }
  0x19   :  { %p73_p12 = pnand %p72_p11, %p66_p8 }
  0x85   :  { %v23_v1 = vpop.permute.xlu0 %22 }
  0x86   :  { %24 = vst [vmem:[#allocation5] sm:$0xff] %v23_v1 }
  0x87   :  { %76 = shalt.err (!%p73_p12)
}
  0x88   :  { %s77_s0 = scalar_lea.hbm %s129_s1, 128 }
  0x89   :  { %p78_p13 = scmp.ne.s32.totalorder %s129_s1, %s77_s0  ;;  %p81_p0 = scmp.lt.u32.totalorder %s77_s0, %s129_s1 }
  0x8b   :  { %p83_p1 = pnand %p81_p0, %p78_p13 }
  0x8d   :  { %86 = shalt.err (!%p83_p1)
}
  0x8e   :  { %34 = dma.vmem_to_hbm [thread:$0]  %s32_s20, 128, %s129_s1, [#allocation4]  }
  0x8f   :  { %89 = dma.done.wait [#allocation4], 128  }
  0x90   :  { %90 = vsyncadd [#allocation4], 4294967168 }
  0x91   :  { %38 = vsyncpa [#allocation3], 1 }
  0x92   :  { %39 = vsyncpa [#allocation4], 1 }

</bundles_post_ra>
